<compile_context>
chip_gen: v7x
topology: tpu7x:2x2x1
jax: 0.10.0
libtpu: 0.0.40
codegen_flags: <defaults>
</compile_context>

<pallas_src>
import math
import functools

import jax
import jax.numpy as jnp
from jax import lax
from jax.experimental import pallas as pl
from jax.experimental.pallas import tpu as pltpu


def _round_up(x, m):
    return ((x + m - 1) // m) * m


def _lm_head_kernel(feat_ref, wd_ref, bd_ref, gamma_ref, beta_ref,
                    wrt_ref, wlt_ref, bias_ref, out_ref, h2_ref, *, mm_dtype):
    """grid = (row_tiles, vocab_tiles); vocab is the inner ("arbitrary") axis.

    At vocab index 0 the dense -> gelu -> layernorm -> (x @ Wr^T) stage runs once
    for the row tile and the (TN, Kp) result is stashed in VMEM scratch (already
    in matmul dtype); every vocab step then only does the cheap
    (TN, Kp) @ (Kp, TV) projection plus an f32 bias add.
    """

    @pl.when(pl.program_id(1) == 0)
    def _compute_h2():
        x = feat_ref[...].astype(mm_dtype)                          # (TN, E)
        # dense: x @ Wd + bd   (MXU, f32 accumulate; bias add in f32)
        x = jnp.dot(x, wd_ref[...], preferred_element_type=jnp.float32) + bd_ref[...]
        # exact (erf) GELU, matching torch.nn.functional.gelu -- f32 on VPU/EUP
        # TODO(synk): only the RoBERTa-default 'gelu' activation_fn is implemented;
        # other fairseq activation choices would need additional kernel variants.
        x = 0.5 * x * (1.0 + lax.erf(x * (1.0 / math.sqrt(2.0))))
        # LayerNorm over the embedding dim, eps=1e-5, affine -- f32
        mean = jnp.mean(x, axis=-1, keepdims=True)
        var = jnp.mean(jnp.square(x - mean), axis=-1, keepdims=True)
        x = (x - mean) * lax.rsqrt(var + 1e-5)
        x = x * gamma_ref[...] + beta_ref[...]
        # first low-rank factor: (TN, E) @ (E, Kp) -> (TN, Kp); cast once here.
        h2 = jnp.dot(x.astype(mm_dtype), wrt_ref[...],
                     preferred_element_type=jnp.float32)
        h2_ref[...] = h2.astype(h2_ref.dtype)

    # second low-rank factor for one vocab tile: (TN, Kp) @ (Kp, TV) + bias (f32)
    out = jnp.dot(h2_ref[...], wlt_ref[...],
                  preferred_element_type=jnp.float32) + bias_ref[...]
    out_ref[...] = out.astype(out_ref.dtype)


def prepare_lm_head_weights(params, *, matmul_dtype=jnp.bfloat16, vocab_tile=2048):
    """One-time (per parameter set) weight layout prep.  Reuse across calls.

    Transposes weights to (in, out) so the kernel only issues lane-dense `x @ W`
    MXU matmuls, zero-pads the low rank K to a multiple of 128 (lane density /
    MXU depth; zero columns/rows are a numerical no-op), zero-pads the vocab dim
    to a multiple of the vocab tile, and casts matmul operands to matmul_dtype.
    Doing this once avoids an extra ~K*V HBM read+write pass on every forward.
    """
    dense_w = params["dense_w"]        # (E, E)  torch layout (out, in)
    dense_b = params["dense_b"]        # (E,)
    gamma = params["ln_gamma"]         # (E,)
    beta = params["ln_beta"]           # (E,)
    weight_l = params["weight_l"]      # (V, K)
    weight_r = params["weight_r"]      # (K, E)
    bias = params["bias"]              # (V,)

    E = dense_w.shape[0]
    V, K = weight_l.shape
    Kp = _round_up(K, 128)                                  # lane-dense low rank
    TV = min(_round_up(vocab_tile, 128), _round_up(V, 128))  # lane-dense vocab tile
    Vp = _round_up(V, TV)

    wr_t = jnp.zeros((E, Kp), matmul_dtype).at[:, :K].set(
        weight_r.T.astype(matmul_dtype))                    # (E, Kp)
    wl_t = jnp.zeros((Kp, Vp), matmul_dtype).at[:K, :V].set(
        weight_l.T.astype(matmul_dtype))                    # (Kp, Vp)
    bias_p = jnp.zeros((1, Vp), jnp.float32).at[:, :V].set(
        bias.reshape(1, V).astype(jnp.float32))

    return {
        "wd_t": dense_w.T.astype(matmul_dtype),             # (E, E) (in, out)
        "bd": dense_b.reshape(1, E).astype(jnp.float32),
        "gamma": gamma.reshape(1, E).astype(jnp.float32),
        "beta": beta.reshape(1, E).astype(jnp.float32),
        "wr_t": wr_t,
        "wl_t": wl_t,
        "bias": bias_p,
        "embed_dim": E,
        "out_dim": V,
        "k_padded": Kp,
        "vocab_tile": TV,
        "matmul_dtype": matmul_dtype,
    }


def _vmem_limit_bytes(estimate):
    """Scoped-VMEM budget capped per generation (v7x 64 MiB/TC, v5e/v6e 128 MiB)."""
    try:
        cap = int(pltpu.get_tpu_info().vmem_capacity_bytes)
    except Exception:
        cap = 64 * 1024 * 1024                 # conservative v7x-class fallback
    cap = int(0.8 * cap)                       # headroom for compiler-internal scratch
    return int(min(max(2 * estimate, 32 * 1024 * 1024), cap))


def decomposed_roberta_lm_head(features, prepped, *, row_tile=512,
                               out_dtype=jnp.bfloat16):
    """features: (N, E); prepped: output of prepare_lm_head_weights().

    Returns logits of shape (N, V) in out_dtype (bf16 by default -- the logits
    tile is the dominant HBM stream of this memory-bound kernel).
    """
    N, E = features.shape
    assert E == prepped["embed_dim"]
    V = prepped["out_dim"]
    Kp = prepped["k_padded"]
    TV = prepped["vocab_tile"]
    mm_dtype = prepped["matmul_dtype"]

    # Row tile: multiple of 8, clamped for small N.  NOTE (v7x megacore): the
    # row axis is "parallel"; keep cdiv(N, TN) >= 2 (lower row_tile for tiny-N
    # inference) so both TensorCores get work.
    TN = min(_round_up(row_tile, 8), _round_up(N, 8))
    grid = (pl.cdiv(N, TN), pl.cdiv(V, TV))

    mm_bytes = jnp.dtype(mm_dtype).itemsize
    out_bytes = jnp.dtype(out_dtype).itemsize
    feat_bytes = jnp.dtype(features.dtype).itemsize
    est = (2 * TN * E * feat_bytes            # feature tiles (double-buffered)
           + 2 * E * E * mm_bytes             # dense weight
           + 2 * E * Kp * mm_bytes            # Wr^T
           + 2 * Kp * TV * mm_bytes           # Wl^T vocab tile
           + 2 * TN * TV * out_bytes          # output tiles
           + TN * Kp * mm_bytes               # h2 scratch
           + 8 * (3 * E + TV) * 4)            # small (1, E) / (1, TV) vectors
    vmem_limit = _vmem_limit_bytes(est)

    kernel = functools.partial(_lm_head_kernel, mm_dtype=mm_dtype)

    # Edge tiles: input reads past N are garbage but strictly row-local (dense /
    # gelu / LN / both matmuls are row-wise), and output writes past N / V are
    # dropped by Pallas, so no padded logits buffer or post-slice is needed.
    return pl.pallas_call(
        kernel,
        out_shape=jax.ShapeDtypeStruct((N, V), out_dtype),
        grid_spec=pltpu.PrefetchScalarGridSpec(
            num_scalar_prefetch=0,
            grid=grid,
            in_specs=[
                pl.BlockSpec((TN, E), lambda i, j: (i, 0)),    # features row tile
                pl.BlockSpec((E, E), lambda i, j: (0, 0)),     # dense weight (in, out)
                pl.BlockSpec((1, E), lambda i, j: (0, 0)),     # dense bias
                pl.BlockSpec((1, E), lambda i, j: (0, 0)),     # ln gamma
                pl.BlockSpec((1, E), lambda i, j: (0, 0)),     # ln beta
                pl.BlockSpec((E, Kp), lambda i, j: (0, 0)),    # Wr^T  (E, Kp)
                pl.BlockSpec((Kp, TV), lambda i, j: (0, j)),   # Wl^T vocab tile
                pl.BlockSpec((1, TV), lambda i, j: (0, j)),    # output bias tile
            ],
            out_specs=pl.BlockSpec((TN, TV), lambda i, j: (i, j)),
            scratch_shapes=[pltpu.VMEM((TN, Kp), mm_dtype)],   # h2 carried over vocab
        ),
        compiler_params=pltpu.CompilerParams(
            dimension_semantics=("parallel", "arbitrary"),
            vmem_limit_bytes=vmem_limit),
    )(features, prepped["wd_t"], prepped["bd"], prepped["gamma"],
      prepped["beta"], prepped["wr_t"], prepped["wl_t"], prepped["bias"])


def _reference(features, params):
    """Pure-JAX reference mirroring the PyTorch forward."""
    x = features @ params["dense_w"].T + params["dense_b"]
    x = 0.5 * x * (1.0 + lax.erf(x / math.sqrt(2.0)))
    mean = jnp.mean(x, axis=-1, keepdims=True)
    var = jnp.mean(jnp.square(x - mean), axis=-1, keepdims=True)
    x = (x - mean) / jnp.sqrt(var + 1e-5)
    x = x * params["ln_gamma"] + params["ln_beta"]
    w = params["weight_l"] @ params["weight_r"]                  # (V, E)
    return x @ w.T + params["bias"]


if __name__ == "__main__":
    # Small shapes consistent with the module: batch=2, seq=8, embed_dim=32,
    # k=16 (low rank), output_dim (vocab) = 64.
    batch, seq, E, K, V = 2, 8, 32, 16, 64
    N = batch * seq

    key = jax.random.PRNGKey(0)
    ks = jax.random.split(key, 7)

    features = jax.random.normal(ks[0], (batch, seq, E), dtype=jnp.float32)

    params = {
        # nn.Linear(E, E): weight (out,in), bias (out,)
        "dense_w": jax.random.normal(ks[1], (E, E), dtype=jnp.float32) / math.sqrt(E),
        "dense_b": jax.random.normal(ks[2], (E,), dtype=jnp.float32) * 0.1,
        # LayerNorm(E): perturbed from ones/zeros for a non-trivial test.
        "ln_gamma": 1.0 + 0.1 * jax.random.normal(ks[3], (E,), dtype=jnp.float32),
        "ln_beta": 0.1 * jax.random.normal(ks[4], (E,), dtype=jnp.float32),
        # Decomposed output weight (forward-consistent shapes, see NOTE above).
        "weight_l": jax.random.normal(ks[5], (V, K), dtype=jnp.float32) / math.sqrt(K),
        "weight_r": jax.random.normal(ks[6], (K, E), dtype=jnp.float32) / math.sqrt(E),
        # nn.Parameter(torch.zeros(output_dim))
        "bias": jnp.zeros((V,), dtype=jnp.float32),
    }

    feats_2d = features.reshape(N, E)
    ref = _reference(features, params)

    # f32 matmul-operand / f32 logits path: strict check against the reference.
    prep_f32 = prepare_lm_head_weights(params, matmul_dtype=jnp.float32)
    out = decomposed_roberta_lm_head(feats_2d, prep_f32, out_dtype=jnp.float32)
    out = jax.block_until_ready(out).reshape(batch, seq, V)
    assert out.shape == (batch, seq, V)
    assert jnp.allclose(out, ref, atol=1e-4, rtol=1e-4), "f32 mismatch vs JAX reference"

    # Default production path (all generations): bf16 matmul operands + bf16
    # logits, f32 accumulation and f32 gelu/LN/bias epilogue.  Loose tolerance
    # check only (bf16 operand/output rounding).
    prep = prepare_lm_head_weights(params)                 # matmul_dtype=bf16
    out_bf16 = decomposed_roberta_lm_head(feats_2d, prep)  # out_dtype=bf16
    out_bf16 = jax.block_until_ready(out_bf16).astype(jnp.float32).reshape(batch, seq, V)
    assert out_bf16.shape == (batch, seq, V)
    assert bool(jnp.all(jnp.isfinite(out_bf16)))
    assert jnp.allclose(out_bf16, ref, atol=0.3, rtol=0.06), "bf16 path diverged"

    print("KERNEL_OK")
</pallas_src>

<mosaic_0001>
module attributes {stable_mosaic.version = 11 : i64} {
  func.func @_lm_head_kernel(%arg0: i32, %arg1: i32, %arg2: memref<16x32xf32, #tpu.memory_space<vmem>>, %arg3: memref<32x32xf32, #tpu.memory_space<vmem>>, %arg4: memref<1x32xf32, #tpu.memory_space<vmem>>, %arg5: memref<1x32xf32, #tpu.memory_space<vmem>>, %arg6: memref<1x32xf32, #tpu.memory_space<vmem>>, %arg7: memref<32x128xf32, #tpu.memory_space<vmem>>, %arg8: memref<128x128xf32, #tpu.memory_space<vmem>>, %arg9: memref<1x128xf32, #tpu.memory_space<vmem>>, %arg10: memref<16x128xf32, #tpu.memory_space<vmem>>, %arg11: memref<16x128xf32, #tpu.memory_space<vmem>>) attributes {dimension_semantics = [#tpu.dimension_semantics<parallel>, #tpu.dimension_semantics<arbitrary>], iteration_bounds = array<i64: 1, 1>, scalar_prefetch = 0 : i64, scratch_operands = 1 : i64, tpu.core_type = #tpu.core_type<tc>, window_params = [{transform_indices = @transform_0, window_bounds = array<i64: 16, 32>}, {pipeline_mode = #tpu.pipeline_mode<synchronous>, transform_indices = @transform_1, window_bounds = array<i64: 32, 32>}, {pipeline_mode = #tpu.pipeline_mode<synchronous>, transform_indices = @transform_2, window_bounds = array<i64: 1, 32>}, {pipeline_mode = #tpu.pipeline_mode<synchronous>, transform_indices = @transform_3, window_bounds = array<i64: 1, 32>}, {pipeline_mode = #tpu.pipeline_mode<synchronous>, transform_indices = @transform_4, window_bounds = array<i64: 1, 32>}, {pipeline_mode = #tpu.pipeline_mode<synchronous>, transform_indices = @transform_5, window_bounds = array<i64: 32, 128>}, {transform_indices = @transform_6, window_bounds = array<i64: 128, 128>}, {transform_indices = @transform_7, window_bounds = array<i64: 1, 128>}, {transform_indices = @transform_8, window_bounds = array<i64: 16, 128>}]} {
    %c0_i32 = arith.constant 0 : i32
    %0 = arith.cmpi eq, %arg1, %c0_i32 : i32
    %1 = arith.extui %0 : i1 to i32
    %c0_i32_0 = arith.constant 0 : i32
    %2 = arith.cmpi ne, %1, %c0_i32_0 : i32
    scf.if %2 {
      %c0_8 = arith.constant 0 : index
      %c0_9 = arith.constant 0 : index
      %10 = vector.load %arg2[%c0_8, %c0_9] : memref<16x32xf32, #tpu.memory_space<vmem>>, vector<16x32xf32>
      %c0_10 = arith.constant 0 : index
      %c0_11 = arith.constant 0 : index
      %11 = vector.load %arg3[%c0_10, %c0_11] : memref<32x32xf32, #tpu.memory_space<vmem>>, vector<32x32xf32>
      %cst_12 = arith.constant dense<0.000000e+00> : vector<16x32xf32>
      %12 = tpu.matmul %10, %11, %cst_12 {dimension_numbers = #tpu.dot_dimension_numbers<[1], [0], [0], [1], [0, 0, 1, 1], [], []>} : vector<16x32xf32>, vector<32x32xf32>, vector<16x32xf32> -> vector<16x32xf32>
      %c0_13 = arith.constant 0 : index
      %c0_14 = arith.constant 0 : index
      %13 = vector.load %arg4[%c0_13, %c0_14] : memref<1x32xf32, #tpu.memory_space<vmem>>, vector<1x32xf32>
      %14 = vector.broadcast %13 : vector<1x32xf32> to vector<16x32xf32>
      %15 = arith.addf %12, %14 : vector<16x32xf32>
      %cst_15 = arith.constant 5.000000e-01 : f32
      %16 = vector.broadcast %cst_15 : f32 to vector<16x32xf32>
      %17 = arith.mulf %16, %15 : vector<16x32xf32>
      %cst_16 = arith.constant 0.707106769 : f32
      %18 = vector.broadcast %cst_16 : f32 to vector<16x32xf32>
      %19 = arith.mulf %15, %18 : vector<16x32xf32>
      %20 = math.erf %19 : vector<16x32xf32>
      %cst_17 = arith.constant 1.000000e+00 : f32
      %21 = vector.broadcast %cst_17 : f32 to vector<16x32xf32>
      %22 = arith.addf %21, %20 : vector<16x32xf32>
      %23 = arith.mulf %17, %22 : vector<16x32xf32>
      %cst_18 = arith.constant dense<0.000000e+00> : vector<16xf32>
      %24 = vector.multi_reduction <add>, %23, %cst_18 [1] : vector<16x32xf32> to vector<16xf32>
      %25 = vector.shape_cast %24 : vector<16xf32> to vector<16x1xf32>
      %cst_19 = arith.constant 3.200000e+01 : f32
      %26 = vector.broadcast %cst_19 : f32 to vector<16x1xf32>
      %27 = arith.divf %25, %26 : vector<16x1xf32>
      %28 = vector.broadcast %27 : vector<16x1xf32> to vector<16x32xf32>
      %29 = arith.subf %23, %28 : vector<16x32xf32>
      %30 = arith.mulf %29, %29 : vector<16x32xf32>
      %cst_20 = arith.constant dense<0.000000e+00> : vector<16xf32>
      %31 = vector.multi_reduction <add>, %30, %cst_20 [1] : vector<16x32xf32> to vector<16xf32>
      %32 = vector.shape_cast %31 : vector<16xf32> to vector<16x1xf32>
      %cst_21 = arith.constant 3.200000e+01 : f32
      %33 = vector.broadcast %cst_21 : f32 to vector<16x1xf32>
      %34 = arith.divf %32, %33 : vector<16x1xf32>
      %35 = vector.broadcast %27 : vector<16x1xf32> to vector<16x32xf32>
      %36 = arith.subf %23, %35 : vector<16x32xf32>
      %cst_22 = arith.constant 9.99999974E-6 : f32
      %37 = vector.broadcast %cst_22 : f32 to vector<16x1xf32>
      %38 = arith.addf %34, %37 : vector<16x1xf32>
      %39 = math.rsqrt %38 : vector<16x1xf32>
      %40 = vector.broadcast %39 : vector<16x1xf32> to vector<16x32xf32>
      %41 = arith.mulf %36, %40 : vector<16x32xf32>
      %c0_23 = arith.constant 0 : index
      %c0_24 = arith.constant 0 : index
      %42 = vector.load %arg5[%c0_23, %c0_24] : memref<1x32xf32, #tpu.memory_space<vmem>>, vector<1x32xf32>
      %43 = vector.broadcast %42 : vector<1x32xf32> to vector<16x32xf32>
      %44 = arith.mulf %41, %43 : vector<16x32xf32>
      %c0_25 = arith.constant 0 : index
      %c0_26 = arith.constant 0 : index
      %45 = vector.load %arg6[%c0_25, %c0_26] : memref<1x32xf32, #tpu.memory_space<vmem>>, vector<1x32xf32>
      %46 = vector.broadcast %45 : vector<1x32xf32> to vector<16x32xf32>
      %47 = arith.addf %44, %46 : vector<16x32xf32>
      %c0_27 = arith.constant 0 : index
      %c0_28 = arith.constant 0 : index
      %48 = vector.load %arg7[%c0_27, %c0_28] : memref<32x128xf32, #tpu.memory_space<vmem>>, vector<32x128xf32>
      %cst_29 = arith.constant dense<0.000000e+00> : vector<16x128xf32>
      %49 = tpu.matmul %47, %48, %cst_29 {dimension_numbers = #tpu.dot_dimension_numbers<[1], [0], [0], [1], [0, 0, 1, 1], [], []>} : vector<16x32xf32>, vector<32x128xf32>, vector<16x128xf32> -> vector<16x128xf32>
      %c0_30 = arith.constant 0 : index
      %c0_31 = arith.constant 0 : index
      %50 = vector.load %arg11[%c0_30, %c0_31] : memref<16x128xf32, #tpu.memory_space<vmem>>, vector<16x128xf32>
      tpu.vector_store %arg11[%c0_30, %c0_31], %49 {strides = array<i32>} : memref<16x128xf32, #tpu.memory_space<vmem>>, vector<16x128xf32>,
    } else {
    }
    %c0 = arith.constant 0 : index
    %c0_1 = arith.constant 0 : index
    %3 = vector.load %arg11[%c0, %c0_1] : memref<16x128xf32, #tpu.memory_space<vmem>>, vector<16x128xf32>
    %c0_2 = arith.constant 0 : index
    %c0_3 = arith.constant 0 : index
    %4 = vector.load %arg8[%c0_2, %c0_3] : memref<128x128xf32, #tpu.memory_space<vmem>>, vector<128x128xf32>
    %cst = arith.constant dense<0.000000e+00> : vector<16x128xf32>
    %5 = tpu.matmul %3, %4, %cst {dimension_numbers = #tpu.dot_dimension_numbers<[1], [0], [0], [1], [0, 0, 1, 1], [], []>} : vector<16x128xf32>, vector<128x128xf32>, vector<16x128xf32> -> vector<16x128xf32>
    %c0_4 = arith.constant 0 : index
    %c0_5 = arith.constant 0 : index
    %6 = vector.load %arg9[%c0_4, %c0_5] : memref<1x128xf32, #tpu.memory_space<vmem>>, vector<1x128xf32>
    %7 = vector.broadcast %6 : vector<1x128xf32> to vector<16x128xf32>
    %8 = arith.addf %5, %7 : vector<16x128xf32>
    %c0_6 = arith.constant 0 : index
    %c0_7 = arith.constant 0 : index
    %9 = vector.load %arg10[%c0_6, %c0_7] : memref<16x128xf32, #tpu.memory_space<vmem>>, vector<16x128xf32>
    tpu.vector_store %arg10[%c0_6, %c0_7], %8 {strides = array<i32>} : memref<16x128xf32, #tpu.memory_space<vmem>>, vector<16x128xf32>,
    return
  }
  func.func @transform_0(%arg0: i32, %arg1: i32) -> (i32, i32) {
    %c0_i32 = arith.constant 0 : i32
    %c0_i32_0 = arith.constant 0 : i32
    return %arg0, %c0_i32 : i32, i32
  }
  func.func @transform_1(%arg0: i32, %arg1: i32) -> (i32, i32) {
    %c0_i32 = arith.constant 0 : i32
    %c0_i32_0 = arith.constant 0 : i32
    %c0_i32_1 = arith.constant 0 : i32
    return %c0_i32, %c0_i32_0 : i32, i32
  }
  func.func @transform_2(%arg0: i32, %arg1: i32) -> (i32, i32) {
    %c0_i32 = arith.constant 0 : i32
    %c0_i32_0 = arith.constant 0 : i32
    %c0_i32_1 = arith.constant 0 : i32
    return %c0_i32, %c0_i32_0 : i32, i32
  }
  func.func @transform_3(%arg0: i32, %arg1: i32) -> (i32, i32) {
    %c0_i32 = arith.constant 0 : i32
    %c0_i32_0 = arith.constant 0 : i32
    %c0_i32_1 = arith.constant 0 : i32
    return %c0_i32, %c0_i32_0 : i32, i32
  }
  func.func @transform_4(%arg0: i32, %arg1: i32) -> (i32, i32) {
    %c0_i32 = arith.constant 0 : i32
    %c0_i32_0 = arith.constant 0 : i32
    %c0_i32_1 = arith.constant 0 : i32
    return %c0_i32, %c0_i32_0 : i32, i32
  }
  func.func @transform_5(%arg0: i32, %arg1: i32) -> (i32, i32) {
    %c0_i32 = arith.constant 0 : i32
    %c0_i32_0 = arith.constant 0 : i32
    %c0_i32_1 = arith.constant 0 : i32
    return %c0_i32, %c0_i32_0 : i32, i32
  }
  func.func @transform_6(%arg0: i32, %arg1: i32) -> (i32, i32) {
    %c0_i32 = arith.constant 0 : i32
    %c0_i32_0 = arith.constant 0 : i32
    return %c0_i32, %arg1 : i32, i32
  }
  func.func @transform_7(%arg0: i32, %arg1: i32) -> (i32, i32) {
    %c0_i32 = arith.constant 0 : i32
    %c0_i32_0 = arith.constant 0 : i32
    return %c0_i32, %arg1 : i32, i32
  }
  func.func @transform_8(%arg0: i32, %arg1: i32) -> (i32, i32) {
    %c0_i32 = arith.constant 0 : i32
    return %arg0, %arg1 : i32, i32
  }
}

</mosaic_0001>

<bundles_post_ra>
// kernel: tpu_custom_call.1
= control target key start
LH: loop header
LB: loop body
LE: loop exit
PB: predicated region body
PF: predicated region fallthrough
CT: control target
= control target key end

     0   :  { %13 = vsyncpa [#allocation4], 0  ;;  %s894_s0 = inlined_call_operand.hbm [shape: f32[16,32], index: 0, kind: input, shape index: {}]   ;;  %s895_s1 = inlined_call_operand.hbm [shape: f32[32,32], index: 1, kind: input, shape index: {}]   ;;  %s896_s2 = inlined_call_operand.vmem [shape: f32[1,32], index: 2, kind: input, shape index: {}]   ;;  %s897_s3 = inlined_call_operand.vmem [shape: f32[1,32], index: 3, kind: input, shape index: {}]   ;;  %s898_s4 = inlined_call_operand.vmem [shape: f32[1,32], index: 4, kind: input, shape index: {}]   ;;  %s899_s5 = inlined_call_operand.hbm [shape: f32[32,128], index: 5, kind: input, shape index: {}]   ;;  %s900_s6 = inlined_call_operand.hbm [shape: f32[128,128], index: 6, kind: input, shape index: {}]   ;;  %s901_s7 = inlined_call_operand.vmem [shape: f32[1,128], index: 7, kind: input, shape index: {}]   ;;  %s902_s8 = inlined_call_operand.hbm [shape: f32[16,64], index: 8, kind: output, shape index: {}]  }
   0x1   :  { %14 = vsyncpa [#allocation7], 0 }
   0x2   :  { %15 = vsyncpa [#allocation10], 0 }
   0x3   :  { %16 = vsyncpa [#allocation5], 0  ;;  %s723_s27 = smov [#allocation6]   ;;  %s724_s29 = smov [#allocation3]  }
   0x4   :  { %s34_s28 = sshll.u32 %s723_s27, 4  ;;  %s22_s30 = sshll.u32 %s724_s29, 4  ;;  %s35_s28 = int_to_ptr.vmem [resolvable:$true] %s34_s28  ;;  %s775_s30 = int_to_ptr.vmem [resolvable:$true] %s22_s30 }
   0x5   :  { %s605_s11 = scalar_lea.hbm %s895_s1, 512 }
   0x6   :  { %p606_p0 = scmp.ne.s32.totalorder %s895_s1, %s605_s11  ;;  %p609_p1 = scmp.lt.u32.totalorder %s605_s11, %s895_s1 }
   0x8   :  { %p611_p2 = pnand %p609_p1, %p606_p0 }
   0xa   :  { %614 = shalt.err (!%p611_p2)
}
   0xb   :  { %s615_s16 = scalar_lea.vmem %s35_s28, 512  ;;  %p620_p4 = scmp.lt.s32.totalorder %s35_s28, %s35_s28 }
   0xc   :  { %p616_p3 = scmp.ne.s32.totalorder %s35_s28, %s615_s16  ;;  %p621_p5 = scmp.lt.s32.totalorder %s615_s16, %s615_s16 }
   0xe   :  { %p622_p6 = por %p621_p5, %p620_p4 }
  0x10   :  { %p623_p7 = pnand %p622_p6, %p616_p3 }
  0x12   :  { %626 = shalt.err (!%p623_p7)
}
  0x13   :  { %s725_s17 = smov 128   ;;  %s726_s18 = smov 8  }
  0x14   :  { %40 = dma.hbm_to_vmem [thread:$0]  %s895_s1, 512, %s35_s28, [#allocation7], %s725_s17, %s725_s17, %s726_s18  }
  0x15   :  { %s627_s23 = scalar_lea.hbm %s894_s0, 256 }
  0x16   :  { %p628_p8 = scmp.ne.s32.totalorder %s894_s0, %s627_s23  ;;  %p631_p9 = scmp.lt.u32.totalorder %s627_s23, %s894_s0 }
  0x18   :  { %p633_p10 = pnand %p631_p9, %p628_p8 }
  0x1a   :  { %636 = shalt.err (!%p633_p10)
}
  0x1b   :  { %s637_s29 = scalar_lea.vmem %s775_s30, 256  ;;  %p642_p12 = scmp.lt.s32.totalorder %s775_s30, %s775_s30 }
  0x1c   :  { %p638_p11 = scmp.ne.s32.totalorder %s775_s30, %s637_s29  ;;  %p643_p13 = scmp.lt.s32.totalorder %s637_s29, %s637_s29 }
  0x1e   :  { %p644_p0 = por %p643_p13, %p642_p12 }
  0x20   :  { %p645_p1 = pnand %p644_p0, %p638_p11 }
  0x22   :  { %648 = shalt.err (!%p645_p1)
}
  0x23   :  { %28 = dma.hbm_to_vmem [thread:$0]  %s894_s0, 256, %s775_s30, [#allocation4], %s725_s17, %s725_s17, %s726_s18  }
  0x24   :  { %s727_s9 = smov [#allocation8]   ;;  %s728_s11 = smov [#allocation9]  }
  0x25   :  { %s52_s10 = sshll.u32 %s727_s9, 4  ;;  %s64_s12 = sshll.u32 %s728_s11, 4  ;;  %s53_s10 = int_to_ptr.vmem [resolvable:$true] %s52_s10  ;;  %s812_s12 = int_to_ptr.vmem [resolvable:$true] %s64_s12 }
  0x26   :  { %s649_s15 = scalar_lea.hbm %s899_s5, 512 }
  0x27   :  { %p650_p2 = scmp.ne.s32.totalorder %s899_s5, %s649_s15  ;;  %p653_p3 = scmp.lt.u32.totalorder %s649_s15, %s899_s5 }
  0x29   :  { %p655_p4 = pnand %p653_p3, %p650_p2 }
  0x2b   :  { %658 = shalt.err (!%p655_p4)
}
  0x2c   :  { %s659_s0 = scalar_lea.vmem %s53_s10, 512  ;;  %p664_p6 = scmp.lt.s32.totalorder %s53_s10, %s53_s10 }
  0x2d   :  { %p660_p5 = scmp.ne.s32.totalorder %s53_s10, %s659_s0  ;;  %p665_p7 = scmp.lt.s32.totalorder %s659_s0, %s659_s0 }
  0x2f   :  { %p666_p8 = por %p665_p7, %p664_p6 }
  0x31   :  { %p667_p9 = pnand %p666_p8, %p660_p5 }
  0x33   :  { %670 = shalt.err (!%p667_p9)
}
  0x34   :  { %58 = dma.hbm_to_vmem [thread:$0]  %s899_s5, 512, %s53_s10, [#allocation7], %s725_s17, %s725_s17, %s726_s18  }
  0x35   :  { %s671_s25 = scalar_lea.hbm %s900_s6, 2048 }
  0x36   :  { %p672_p10 = scmp.ne.s32.totalorder %s900_s6, %s671_s25  ;;  %p675_p11 = scmp.lt.u32.totalorder %s671_s25, %s900_s6 }
  0x38   :  { %p677_p12 = pnand %p675_p11, %p672_p10 }
  0x3a   :  { %680 = shalt.err (!%p677_p12)
}
  0x3b   :  { %s681_s28 = scalar_lea.vmem %s812_s12, 2048  ;;  %p686_p0 = scmp.lt.s32.totalorder %s812_s12, %s812_s12 }
  0x3c   :  { %p682_p13 = scmp.ne.s32.totalorder %s812_s12, %s681_s28  ;;  %p687_p1 = scmp.lt.s32.totalorder %s681_s28, %s681_s28 }
  0x3e   :  { %p688_p2 = por %p687_p1, %p686_p0 }
  0x40   :  { %p689_p3 = pnand %p688_p2, %p682_p13 }
  0x42   :  { %692 = shalt.err (!%p689_p3)
}
  0x43   :  { %70 = dma.hbm_to_vmem [thread:$0]  %s900_s6, 2048, %s812_s12, [#allocation10], %s725_s17, %s725_s17, %s726_s18  }
  0x44   :  { %715 = dma.done.wait [#allocation4], 256  }
  0x45   :  { %716 = vsyncadd [#allocation4], 4294967040 }
  0x46   :  { %717 = dma.done.wait [#allocation7], 1024  }
  0x47   :  { %718 = vsyncadd [#allocation7], 4294966272 }
  0x48   :  { %719 = dma.done.wait [#allocation10], 2048  }
  0x49   :  { %720 = vsyncadd [#allocation10], 4294965248  ;;  %vm102_vm0 = vcmask 261120   ;;  %v91_v0 = vld [vmem:[#allocation6] sm:$0xff]  ;;  %v92_v1 = vld [vmem:[#allocation6 + $0x8] sm:$0xff] }
  0x4a   :  { %v93_v2 = vld [vmem:[#allocation6 + $0x10] sm:$0xff]  ;;  %v542_v3 = vpack.c.bf16 %v92_v1, %v91_v0  ;;  %v94_v4 = vld [vmem:[#allocation6 + $0x18] sm:$0xff]  ;;  %v239_v35 = vld [vmem:[#allocation8] sm:$0xff] }
  0x4b   :  { %v89_v5 = vld [vmem:[#allocation3] sm:$0xff]  ;;  %v546_v6 = vpack.c.bf16 %v94_v4, %v93_v2  ;;  %v90_v7 = vld [vmem:[#allocation3 + $0x8] sm:$0xff]  ;;  %v240_v36 = vld [vmem:[#allocation8 + $0x8] sm:$0xff] }
  0x4c   :  { %493 = vmatprep.mubr.msk.f32.mxu1 %vm102_vm0, %v89_v5  ;;  %543 = vmatprep.subr.bf16.mxu1 %v542_v3  ;;  %v447_v8 = vld [vmem:[%s896_s2] ss:$0 sm:$0xff]  ;;  %v550_v37 = vpack.c.bf16 %v240_v36, %v239_v35  ;;  %v242_v39 = vld [vmem:[#allocation8 + $0x18] sm:$0xff]  ;;  %v328_v41 = vld [vmem:[#allocation9] sm:$0xff] }
  0x4d   :  { %545 = vmatpush3.bf16.msra.mxu1 %v542_v3  ;;  %v241_v38 = vld [vmem:[#allocation8 + $0x10] sm:$0xff]  ;;  %v329_v42 = vld [vmem:[#allocation9 + $0x8] sm:$0xff]  ;;  %v331_v45 = vld [vmem:[#allocation9 + $0x18] sm:$0xff] }
  0x4e   :  { %547 = vmatprep.subr.bf16.mxu1 %v546_v6  ;;  %v554_v40 = vpack.c.bf16 %v242_v39, %v241_v38  ;;  %v330_v43 = vld [vmem:[#allocation9 + $0x10] sm:$0xff]  ;;  %v558_v44 = vpack.c.bf16 %v329_v42, %v328_v41  ;;  %v332_v47 = vld [vmem:[#allocation9 + $0x20] sm:$0xff]  ;;  %v333_v48 = vld [vmem:[#allocation9 + $0x28] sm:$0xff] }
  0x4f   :  { %v562_v46 = vpack.c.bf16 %v331_v45, %v330_v43  ;;  %v566_v49 = vpack.c.bf16 %v333_v48, %v332_v47  ;;  %v334_v50 = vld [vmem:[#allocation9 + $0x30] sm:$0xff]  ;;  %v335_v51 = vld [vmem:[#allocation9 + $0x38] sm:$0xff]  ;;  %v336_v53 = vld [vmem:[#allocation9 + $0x40] sm:$0xff] }
  0x50   :  { %559 = vmatprep.subr.bf16.mxu0 %v558_v44  ;;  %v570_v52 = vpack.c.bf16 %v335_v51, %v334_v50  ;;  %v337_v54 = vld [vmem:[#allocation9 + $0x48] sm:$0xff]  ;;  %v338_v56 = vld [vmem:[#allocation9 + $0x50] sm:$0xff]  ;;  %v339_v57 = vld [vmem:[#allocation9 + $0x58] sm:$0xff] }
  0x51   :  { %549 = vmatpush3.bf16.msra.mxu1 %v546_v6  ;;  %561 = vmatpush3.bf16.msra.mxu0 %v558_v44  ;;  %v574_v55 = vpack.c.bf16 %v337_v54, %v336_v53  ;;  %v578_v58 = vpack.c.bf16 %v339_v57, %v338_v56  ;;  %v340_v59 = vld [vmem:[#allocation9 + $0x60] sm:$0xff]  ;;  %v341_v60 = vld [vmem:[#allocation9 + $0x68] sm:$0xff]  ;;  %v342_v62 = vld [vmem:[#allocation9 + $0x70] sm:$0xff] }
  0x52   :  { %551 = vmatprep.subr.bf16.mxu1 %v550_v37  ;;  %563 = vmatprep.subr.bf16.mxu0 %v562_v46  ;;  %v582_v61 = vpack.c.bf16 %v341_v60, %v340_v59  ;;  %v343_v63 = vld [vmem:[#allocation9 + $0x78] sm:$0xff] }
  0x53   :  { %v586_v0 = vpack.c.bf16 %v343_v63, %v342_v62 }
  0x54   :  { %494 = vmatmul.mubr.msk.f32.vlgmr.msra.gmra.mrb[0].mxu1 %vm102_vm0, %v90_v7 }
  0x55   :  { %553 = vmatpush3.bf16.msra.mxu1 %v550_v37  ;;  %565 = vmatpush3.bf16.msra.mxu0 %v562_v46 }
  0x56   :  { %555 = vmatprep.subr.bf16.mxu1 %v554_v40  ;;  %567 = vmatprep.subr.bf16.mxu0 %v566_v49 }
  0x59   :  { %557 = vmatpush3.bf16.msra.mxu1 %v554_v40  ;;  %569 = vmatpush3.bf16.msra.mxu0 %v566_v49 }
  0x5a   :  { %571 = vmatprep.subr.bf16.mxu0 %v570_v52 }
  0x5d   :  { %573 = vmatpush3.bf16.msra.mxu0 %v570_v52 }
  0x5e   :  { %575 = vmatprep.subr.bf16.mxu0 %v574_v55 }
  0x61   :  { %577 = vmatpush3.bf16.msra.mxu0 %v574_v55 }
  0x62   :  { %579 = vmatprep.subr.bf16.mxu0 %v578_v58 }
  0x65   :  { %581 = vmatpush3.bf16.msra.mxu0 %v578_v58 }
  0x66   :  { %583 = vmatprep.subr.bf16.mxu0 %v582_v61 }
  0x69   :  { %585 = vmatpush3.bf16.msra.mxu0 %v582_v61 }
  0x6a   :  { %587 = vmatprep.subr.bf16.mxu0 %v586_v0 }
  0x6d   :  { %589 = vmatpush3.bf16.msra.mxu0 %v586_v0 }
 0x127   :  { %v495_v9 = vpop.f32.mrb[0].mxu1 }
 0x128   :  { %v181_v10 = vadd.f32 %v495_v9, %v447_v8  ;;  %v175_v11 = vpop.f32.mrb[1].mxu1 }
 0x129   :  { %v176_v12 = vadd.f32 %v447_v8, %v175_v11  ;;  %v450_v8 = vld [vmem:[%s897_s3] ss:$0 sm:$0xff] }
 0x12a   :  { %v187_v13 = vmul.f32 0.70710677, %v181_v10  ;;  %v185_v20 = vmul.f32 0.5, %v181_v10  ;;  %v451_v10 = vld [vmem:[%s898_s4] ss:$0 sm:$0xff]  ;;  %s729_s4 = smov [#allocation11]  }
 0x12b   :  { %v186_v14 = vmul.f32 0.70710677, %v176_v12  ;;  %v184_v17 = vmul.f32 0.5, %v176_v12  ;;  %s433_s15 = sshll.u32 %s729_s4, 4  ;;  %s434_s15 = int_to_ptr.vmem [resolvable:$true] %s433_s15 }
 0x12c   :  { %597 = verf.f32 %v187_v13  ;;  %s693_s16 = scalar_lea.vmem %s434_s15, 256  ;;  %p698_p5 = scmp.lt.s32.totalorder %s434_s15, %s434_s15 }
 0x12d   :  { %599 = verf.f32 %v186_v14  ;;  %p694_p4 = scmp.ne.s32.totalorder %s434_s15, %s693_s16  ;;  %p699_p6 = scmp.lt.s32.totalorder %s693_s16, %s693_s16 }
 0x12f   :  { %p700_p7 = por %p699_p6, %p698_p5 }
 0x131   :  { %p701_p8 = pnand %p700_p7, %p694_p4 }
 0x136   :  { %v598_v15 = vpop.eup %597 }
 0x137   :  { %v600_v16 = vpop.eup %599  ;;  %v191_v19 = vadd.f32 1.0, %v598_v15 }
 0x138   :  { %v190_v18 = vadd.f32 1.0, %v600_v16 }
 0x139   :  { %v193_v23 = vmul.f32 %v191_v19, %v185_v20  ;;  %v454_v19 = vld [vmem:[%s901_s7] ss:$0 sm:$0xff] }
 0x13a   :  { %v192_v21 = vmul.f32 %v190_v18, %v184_v17 }
 0x13b   :  { %v197_v24 = vsel %vm102_vm0, %v193_v23, 0.0 }
 0x13c   :  { %v194_v22 = vsel %vm102_vm0, %v192_v21, 0.0 }
 0x13d   :  { %195 = vadd.xlane.f32.xlu0 %v194_v22 }
 0x141   :  { %198 = vadd.xlane.f32.xlu0 %v197_v24 }
 0x1ca   :  { %v196_v25 = vpop.xlane.xlu0 %195 }
 0x1cb   :  { %v201_v26 = vmul.f32 0.03125, %v196_v25 }
 0x1cd   :  { %v856_v27 = vsub.f32 %v192_v21, %v201_v26 }
 0x1ce   :  { %v199_v28 = vpop.xlane.xlu0 %198 }
 0x1cf   :  { %v202_v29 = vmul.f32 0.03125, %v199_v28  ;;  %v205_v30 = vmul.f32 %v856_v27, %v856_v27 }
 0x1d1   :  { %v860_v31 = vsub.f32 %v193_v23, %v202_v29  ;;  %v207_v32 = vsel %vm102_vm0, %v205_v30, 0.0 }
 0x1d2   :  { %208 = vadd.xlane.f32.xlu1 %v207_v32 }
 0x1d3   :  { %v206_v33 = vmul.f32 %v860_v31, %v860_v31 }
 0x1d5   :  { %v210_v34 = vsel %vm102_vm0, %v206_v33, 0.0 }
 0x1d6   :  { %211 = vadd.xlane.f32.xlu1 %v210_v34 }
 0x25f   :  { %v209_v1 = vpop.xlane.xlu1 %208 }
 0x260   :  { %v213_v2 = vmul.f32 0.03125, %v209_v1 }
 0x262   :  { %v215_v3 = vadd.f32 1e-05, %v213_v2 }
 0x263   :  { %v212_v4 = vpop.xlane.xlu1 %211 }
 0x264   :  { %601 = vrsqrt.f32 %v215_v3  ;;  %v214_v5 = vmul.f32 0.03125, %v212_v4 }
 0x266   :  { %v216_v6 = vadd.f32 1e-05, %v214_v5 }
 0x268   :  { %603 = vrsqrt.f32 %v216_v6 }
 0x26e   :  { %v602_v7 = vpop.eup %601 }
 0x26f   :  { %v219_v9 = vmul.f32 %v602_v7, %v856_v27 }
 0x271   :  { %v228_v11 = vmul.f32 %v450_v8, %v219_v9 }
 0x272   :  { %v604_v12 = vpop.eup %603 }
 0x273   :  { %v220_v13 = vmul.f32 %v604_v12, %v860_v31  ;;  %v237_v14 = vadd.f32 %v451_v10, %v228_v11 }
 0x275   :  { %v229_v15 = vmul.f32 %v450_v8, %v220_v13  ;;  %504 = vmatprep.mubr.msk.f32.mxu1 %vm102_vm0, %v237_v14 }
 0x277   :  { %v238_v16 = vadd.f32 %v451_v10, %v229_v15 }
 0x279   :  { %505 = vmatmul.mubr.msk.f32.vlgmr.msra.gmra.mrb[2].mxu1 %vm102_vm0, %v238_v16 }
 0x34c   :  { %v506_v17 = vpop.f32.mrb[2].mxu1 }
 0x34d   :  { %v315_v18 = vpop.f32.mrb[3].mxu1 }
 0x34e   :  { %539 = vmatprep.mubr.f32.mxu0 %v315_v18 }
 0x34f   :  { %540 = vmatmul.mubr.f32.vlgmr.msra.gmra.mrb[0].mxu0 %v506_v17 }
 0x422   :  { %v541_v20 = vpop.f32.mrb[0].mxu0 }
 0x423   :  { %v423_v21 = vadd.f32 %v541_v20, %v454_v19  ;;  %v417_v22 = vpop.f32.mrb[1].mxu0 }
 0x424   :  { %v418_v23 = vadd.f32 %v454_v19, %v417_v22 }
 0x425   :  { %427 = vst [vmem:[#allocation11 + $0x8] sm:$0xff] %v423_v21 }
 0x426   :  { %426 = vst [vmem:[#allocation11] sm:$0xff] %v418_v23 }
 0x427   :  { %704 = shalt.err (!%p701_p8)
}
 0x428   :  { %s705_s7 = scalar_lea.hbm %s902_s8, 256 }
 0x429   :  { %p706_p9 = scmp.ne.s32.totalorder %s902_s8, %s705_s7  ;;  %p709_p10 = scmp.lt.u32.totalorder %s705_s7, %s902_s8 }
 0x42b   :  { %p711_p11 = pnand %p709_p10, %p706_p9 }
 0x42d   :  { %714 = shalt.err (!%p711_p11)
}
 0x42e   :  { %439 = dma.vmem_to_hbm [thread:$0]  %s434_s15, 256, %s902_s8, [#allocation5], %s725_s17, %s725_s17, %s726_s18  }
 0x42f   :  { %721 = dma.done.wait [#allocation5], 256  }
 0x430   :  { %722 = vsyncadd [#allocation5], 4294967040 }
 0x431   :  { %443 = vsyncpa [#allocation4], 1 }
 0x432   :  { %444 = vsyncpa [#allocation7], 1 }
 0x433   :  { %445 = vsyncpa [#allocation10], 1 }
 0x434   :  { %446 = vsyncpa [#allocation5], 1 }

</bundles_post_ra>
